<compile_context>
chip_gen: v5e
topology: v5e:2x2
jax: 0.10.0
libtpu: 0.0.40
codegen_flags: <defaults>
</compile_context>

<pallas_src>
import functools

import jax
import jax.numpy as jnp
from jax import lax
from jax.experimental import pallas as pl
from jax.experimental.pallas import tpu as pltpu


def _round_up(x, m):
    return (x + m - 1) // m * m


def _lmhead_kernel_tiled_h(h_ref, w_ref, o_ref):
    """Hidden tiled as (tm, tk); grid = (m_tiles, vocab_tiles, k_tiles)."""
    @pl.when(pl.program_id(2) == 0)
    def _():
        o_ref[...] = jnp.zeros_like(o_ref)

    # h_ref: (tm, tk), w_ref: (tn, tk) -> (tm, tn) fp32, accumulated in o_ref.
    o_ref[...] += lax.dot_general(
        h_ref[...],
        w_ref[...],
        dimension_numbers=(((1,), (1,)), ((), ())),
        preferred_element_type=jnp.float32,
    )


def _lmhead_kernel_resident_h(h_ref, w_ref, o_ref, *, tk):
    """Hidden row-block (tm, Hp) resident across the whole vocab/k sweep."""
    k = pl.program_id(2)

    @pl.when(k == 0)
    def _():
        o_ref[...] = jnp.zeros_like(o_ref)

    kk = pl.multiple_of(k * tk, 128)
    h_blk = h_ref[:, pl.ds(kk, tk)]          # (tm, tk) slice of the resident block
    o_ref[...] += lax.dot_general(
        h_blk,
        w_ref[...],
        dimension_numbers=(((1,), (1,)), ((), ())),
        preferred_element_type=jnp.float32,
    )


def lm_head(hidden_states, word_embeddings, *, tm=512, tn=1024, tk=1024):
    """hidden_states: [B, S, H] (any float dtype), word_embeddings: [V, H].

    Returns fp32 logits of shape [B, S, V], matching
    F.linear(hidden_states.to(W.dtype), W).float().
    """
    B, S, H = hidden_states.shape
    V, H2 = word_embeddings.shape
    assert H == H2, "hidden dim mismatch between activations and embedding weight"

    w_dtype = word_embeddings.dtype
    itemsize = jnp.dtype(w_dtype).itemsize
    # Sublane packing multiple for the second-to-last block dims
    # (fp32 -> 8, bf16/fp16 -> 16, int8/fp8 -> 32).
    sub = 8 * max(1, 4 // itemsize)

    # Cast hidden states to the (tied) embedding dtype, as the module does.
    h = hidden_states.astype(w_dtype).reshape(B * S, H)
    M = B * S

    # Clamp / align tn & tk (lane dims): multiples of 128, no bigger than the array.
    tn = _round_up(min(tn, _round_up(V, 128)), 128)
    tk = _round_up(min(tk, _round_up(H, 128)), 128)
    Hp = _round_up(H, tk)
    Vp = _round_up(V, tn)

    # ------------------------- VMEM budgeting -------------------------------
    try:
        phys_vmem = int(pltpu.get_tpu_info().vmem_capacity_bytes)
    except Exception:
        phys_vmem = 64 * 1024 * 1024  # conservative fallback (v7x per-TC)
    # Leave ~25% headroom for compiler scratch; cap at ~100 MiB.
    budget = min((phys_vmem * 3) // 4, 100 * 1024 * 1024)

    def _vmem_bytes(tm_, resident):
        w_buf = 2 * tn * tk * itemsize                      # weight, double-buffered
        o_buf = 2 * tm_ * tn * 4                            # fp32 output, double-buffered
        h_buf = 2 * tm_ * (Hp if resident else tk) * itemsize
        return w_buf + o_buf + h_buf

    # Pick tm: prefer the largest tm (<= desired) that keeps the hidden row-block
    # resident within the VMEM budget; shrink tm (down to 128) before giving up
    # residency; only then fall back to (tm, tk)-tiled hidden.
    tm_desired = _round_up(min(tm, _round_up(M, sub)), sub)
    tm_floor = min(tm_desired, max(sub, 128))

    chosen_tm = None
    hidden_resident = True
    cand = tm_desired
    while True:
        if _vmem_bytes(cand, True) <= budget:
            chosen_tm = cand
            break
        if cand <= tm_floor:
            break
        cand = max(tm_floor, _round_up(cand // 2, sub))
    if chosen_tm is None:
        hidden_resident = False
        cand = tm_desired
        while _vmem_bytes(cand, False) > budget and cand > sub:
            cand = max(sub, _round_up(cand // 2, sub))
        chosen_tm = cand
    tm = chosen_tm
    Mp = _round_up(M, tm)

    # Pad only when a dim is not already a tile multiple (zero padding on the
    # reduction dim contributes 0; padded M/V rows/cols are sliced off).
    if (Mp, Hp) != (M, H):
        h = jnp.pad(h, ((0, Mp - M), (0, Hp - H)))
    w = word_embeddings
    if (Vp, Hp) != (V, H):
        w = jnp.pad(w, ((0, Vp - V), (0, Hp - H)))

    grid = (Mp // tm, Vp // tn, Hp // tk)

    if hidden_resident:
        h_spec = pl.BlockSpec((tm, Hp), lambda i, j, k: (i, 0))
        kernel = functools.partial(_lmhead_kernel_resident_h, tk=tk)
    else:
        h_spec = pl.BlockSpec((tm, tk), lambda i, j, k: (i, k))
        kernel = _lmhead_kernel_tiled_h

    vmem_limit = int(min(budget, _vmem_bytes(tm, hidden_resident) + (8 << 20)))
    vmem_limit = max(vmem_limit, 32 << 20)

    cost = pl.CostEstimate(
        flops=2 * M * V * H,
        transcendentals=0,
        bytes_accessed=M * H * itemsize + V * H * itemsize + M * V * 4,
    )

    out = pl.pallas_call(
        kernel,
        out_shape=jax.ShapeDtypeStruct((Mp, Vp), jnp.float32),
        grid_spec=pltpu.PrefetchScalarGridSpec(
            num_scalar_prefetch=0,
            grid=grid,
            in_specs=[
                h_spec,                                          # hidden tile
                pl.BlockSpec((tn, tk), lambda i, j, k: (j, k)),  # weight tile
            ],
            out_specs=pl.BlockSpec((tm, tn), lambda i, j, k: (i, j)),
        ),
        compiler_params=pltpu.CompilerParams(
            dimension_semantics=("parallel", "parallel", "arbitrary"),
            vmem_limit_bytes=vmem_limit,
        ),
        cost_estimate=cost,
    )(h, w)

    if (Mp, Vp) != (M, V):
        out = out[:M, :V]
    return out.reshape(B, S, V)


if __name__ == "__main__":
    key = jax.random.PRNGKey(0)
    k_h, k_w, k_h2, k_w2 = jax.random.split(key, 4)

    # --- Test 1: tile-aligned shapes (fp32 activations, bf16 tied embedding) ---
    batch, seq, hidden, vocab = 2, 8, 128, 256
    hidden_states = jax.random.normal(k_h, (batch, seq, hidden), dtype=jnp.float32)
    word_embeddings = (
        jax.random.normal(k_w, (vocab, hidden), dtype=jnp.float32) * 0.02
    ).astype(jnp.bfloat16)

    logits = lm_head(hidden_states, word_embeddings)
    logits = jax.block_until_ready(logits)

    ref = jnp.einsum(
        "bsh,vh->bsv",
        hidden_states.astype(word_embeddings.dtype),
        word_embeddings,
        preferred_element_type=jnp.float32,
    )
    assert logits.shape == (batch, seq, vocab)
    assert logits.dtype == jnp.float32
    assert jnp.allclose(logits, ref, atol=1e-2, rtol=1e-2)

    # --- Test 2: non-tile-aligned vocab / hidden (exercises the padding path) ---
    b2, s2, h2, v2 = 1, 8, 96, 200
    hs2 = jax.random.normal(k_h2, (b2, s2, h2), dtype=jnp.float32)
    we2 = (
        jax.random.normal(k_w2, (v2, h2), dtype=jnp.float32) * 0.02
    ).astype(jnp.bfloat16)

    logits2 = jax.block_until_ready(lm_head(hs2, we2))
    ref2 = jnp.einsum(
        "bsh,vh->bsv",
        hs2.astype(we2.dtype),
        we2,
        preferred_element_type=jnp.float32,
    )
    assert logits2.shape == (b2, s2, v2)
    assert logits2.dtype == jnp.float32
    assert jnp.allclose(logits2, ref2, atol=1e-2, rtol=1e-2)

    print("KERNEL_OK")
</pallas_src>

<mosaic_0001>
module attributes {stable_mosaic.version = 11 : i64} {
  func.func @_lmhead_kernel_resident_h(%arg0: i32, %arg1: i32, %arg2: i32, %arg3: memref<16x128xbf16, #tpu.memory_space<vmem>>, %arg4: memref<256x128xbf16, #tpu.memory_space<vmem>>, %arg5: memref<16x256xf32, #tpu.memory_space<vmem>>) attributes {dimension_semantics = [#tpu.dimension_semantics<parallel>, #tpu.dimension_semantics<parallel>, #tpu.dimension_semantics<arbitrary>], iteration_bounds = array<i64: 1, 1, 1>, scalar_prefetch = 0 : i64, scratch_operands = 0 : i64, tpu.core_type = #tpu.core_type<tc>, window_params = [{transform_indices = @transform_0, window_bounds = array<i64: 16, 128>}, {transform_indices = @transform_1, window_bounds = array<i64: 256, 128>}, {transform_indices = @transform_2, window_bounds = array<i64: 16, 256>}]} {
    %c0_i32 = arith.constant 0 : i32
    %0 = arith.cmpi eq, %arg2, %c0_i32 : i32
    %1 = arith.extui %0 : i1 to i32
    %c0_i32_0 = arith.constant 0 : i32
    %2 = arith.cmpi ne, %1, %c0_i32_0 : i32
    scf.if %2 {
      %cst_7 = arith.constant 0.000000e+00 : f32
      %12 = vector.broadcast %cst_7 : f32 to vector<16x256xf32>
      %c0_8 = arith.constant 0 : index
      %c0_9 = arith.constant 0 : index
      %13 = vector.load %arg5[%c0_8, %c0_9] : memref<16x256xf32, #tpu.memory_space<vmem>>, vector<16x256xf32>
      tpu.vector_store %arg5[%c0_8, %c0_9], %12 {strides = array<i32>} : memref<16x256xf32, #tpu.memory_space<vmem>>, vector<16x256xf32>,
    } else {
    }
    %c128_i32 = arith.constant 128 : i32
    %3 = arith.muli %arg2, %c128_i32 : i32
    %4 = tpu.assume_multiple %3, 128 : i32
    %c0 = arith.constant 0 : index
    %5 = arith.index_cast %4 : i32 to index
    %6 = vector.load %arg3[%c0, %5] : memref<16x128xbf16, #tpu.memory_space<vmem>>, vector<16x128xbf16>
    %c0_1 = arith.constant 0 : index
    %c0_2 = arith.constant 0 : index
    %7 = vector.load %arg5[%c0_1, %c0_2] : memref<16x256xf32, #tpu.memory_space<vmem>>, vector<16x256xf32>
    %c0_3 = arith.constant 0 : index
    %c0_4 = arith.constant 0 : index
    %8 = vector.load %arg4[%c0_3, %c0_4] : memref<256x128xbf16, #tpu.memory_space<vmem>>, vector<256x128xbf16>
    %cst = arith.constant dense<0.000000e+00> : vector<16x256xf32>
    %9 = tpu.matmul %6, %8, %cst {dimension_numbers = #tpu.dot_dimension_numbers<[1], [1], [0], [0], [0, 0, 1, 0], [], []>} : vector<16x128xbf16>, vector<256x128xbf16>, vector<16x256xf32> -> vector<16x256xf32>
    %10 = arith.addf %7, %9 : vector<16x256xf32>
    %c0_5 = arith.constant 0 : index
    %c0_6 = arith.constant 0 : index
    %11 = vector.load %arg5[%c0_5, %c0_6] : memref<16x256xf32, #tpu.memory_space<vmem>>, vector<16x256xf32>
    tpu.vector_store %arg5[%c0_5, %c0_6], %10 {strides = array<i32>} : memref<16x256xf32, #tpu.memory_space<vmem>>, vector<16x256xf32>,
    return
  }
  func.func @transform_0(%arg0: i32, %arg1: i32, %arg2: i32) -> (i32, i32) {
    %c0_i32 = arith.constant 0 : i32
    %c0_i32_0 = arith.constant 0 : i32
    return %arg0, %c0_i32 : i32, i32
  }
  func.func @transform_1(%arg0: i32, %arg1: i32, %arg2: i32) -> (i32, i32) {
    %c0_i32 = arith.constant 0 : i32
    return %arg1, %arg2 : i32, i32
  }
  func.func @transform_2(%arg0: i32, %arg1: i32, %arg2: i32) -> (i32, i32) {
    %c0_i32 = arith.constant 0 : i32
    return %arg0, %arg1 : i32, i32
  }
}

</mosaic_0001>

<bundles_post_ra>
// kernel: tpu_custom_call.1
= control target key start
LH: loop header
LB: loop body
LE: loop exit
PB: predicated region body
PF: predicated region fallthrough
CT: control target
= control target key end

     0   :  { %7 = vsyncpa [#allocation3], 0  ;;  %s457_s0 = inlined_call_operand.hbm [shape: bf16[16,128], index: 0, kind: input, shape index: {}]   ;;  %s458_s1 = inlined_call_operand.hbm [shape: bf16[256,128], index: 1, kind: input, shape index: {}]   ;;  %s459_s2 = inlined_call_operand.hbm [shape: f32[16,256], index: 2, kind: output, shape index: {}]  }
   0x1   :  { %8 = vsyncpa [#allocation6], 0 }
   0x2   :  { %9 = vsyncpa [#allocation4], 0  ;;  %s14_s11 = sshll.u32 %s457_s0, 4  ;;  %s426_s12 = smov [#allocation2]   ;;  %s15_s11 = int_to_ptr.hbm [resolvable:$true] %s14_s11 }
   0x3   :  { %s16_s13 = sshll.u32 %s426_s12, 4  ;;  %s27_s16 = sshll.u32 %s458_s1, 4  ;;  %s17_s13 = int_to_ptr.vmem [resolvable:$true] %s16_s13  ;;  %s28_s16 = int_to_ptr.hbm [resolvable:$true] %s27_s16 }
   0x4   :  { %s427_s17 = smov 64   ;;  %s428_s18 = smov 4  }
   0x5   :  { %22 = dma.hbm_to_vmem [thread:$0]  %s15_s11, 128, %s17_s13, [#allocation3], %s427_s17, %s427_s17, %s428_s18  }
   0x6   :  { %s429_s19 = smov [#allocation5]  }
   0x7   :  { %s29_s20 = sshll.u32 %s429_s19, 4  ;;  %s30_s20 = int_to_ptr.vmem [resolvable:$true] %s29_s20 }
   0x8   :  { %35 = dma.hbm_to_vmem [thread:$0]  %s28_s16, 2048, %s30_s20, [#allocation6], %s427_s17, %s427_s17, %s428_s18  }
   0x9   :  { %420 = dma.done.wait [#allocation3], 128  }
   0xa   :  { %421 = vsyncadd [#allocation3], 4294967168 }
   0xb   :  { %422 = dma.done.wait [#allocation6], 2048  }
   0xc   :  { %423 = vsyncadd [#allocation6], 4294965248  ;;  %v331_v0 = vld [vmem:[#allocation5 + $0x38] sm:$0xff]  ;;  %v330_v2 = vld [vmem:[#allocation5 + $0x30] sm:$0xff]  ;;  %s430_s0 = smov [#allocation7]   ;;  %s239_s23 = sshll.u32 %s459_s2, 4  ;;  %s240_s23 = int_to_ptr.hbm [resolvable:$true] %s239_s23 }
   0xd   :  { %v339_v1 = vld [vmem:[#allocation5 + $0x78] sm:$0xff]  ;;  %197 = vmatpush.bf16.xpose.msra.mxu0 %v331_v0  ;;  %v338_v3 = vld [vmem:[#allocation5 + $0x70] sm:$0xff]  ;;  %v329_v4 = vld [vmem:[#allocation5 + $0x28] sm:$0xff]  ;;  %s237_s1 = sshll.u32 %s430_s0, 4  ;;  %s431_s24 = smov 256   ;;  %s238_s1 = int_to_ptr.vmem [resolvable:$true] %s237_s1 }
   0xe   :  { %211 = vmatpush.bf16.xpose.msra.mxu1 %v339_v1  ;;  %v337_v5 = vld [vmem:[#allocation5 + $0x68] sm:$0xff]  ;;  %v328_v6 = vld [vmem:[#allocation5 + $0x20] sm:$0xff]  ;;  %v327_v8 = vld [vmem:[#allocation5 + $0x18] sm:$0xff]  ;;  %s432_s25 = smov 16  }
   0xf   :  { %v336_v7 = vld [vmem:[#allocation5 + $0x60] sm:$0xff]  ;;  %v335_v9 = vld [vmem:[#allocation5 + $0x58] sm:$0xff]  ;;  %v326_v10 = vld [vmem:[#allocation5 + $0x10] sm:$0xff] }
  0x10   :  { %v334_v11 = vld [vmem:[#allocation5 + $0x50] sm:$0xff]  ;;  %v325_v12 = vld [vmem:[#allocation5 + $0x8] sm:$0xff]  ;;  %v324_v14 = vld [vmem:[#allocation5] sm:$0xff] }
  0x11   :  { %v333_v13 = vld [vmem:[#allocation5 + $0x48] sm:$0xff]  ;;  %v332_v15 = vld [vmem:[#allocation5 + $0x40] sm:$0xff]  ;;  %v323_v16 = vld [vmem:[#allocation2] sm:$0xff] }
  0x15   :  { %198 = vmatpush.bf16.xpose.msra.mxu0 %v330_v2 }
  0x16   :  { %212 = vmatpush.bf16.xpose.msra.mxu1 %v338_v3 }
  0x1d   :  { %199 = vmatpush.bf16.xpose.msra.mxu0 %v329_v4 }
  0x1e   :  { %213 = vmatpush.bf16.xpose.msra.mxu1 %v337_v5 }
  0x25   :  { %200 = vmatpush.bf16.xpose.msra.mxu0 %v328_v6 }
  0x26   :  { %214 = vmatpush.bf16.xpose.msra.mxu1 %v336_v7 }
  0x2d   :  { %201 = vmatpush.bf16.xpose.msra.mxu0 %v327_v8 }
  0x2e   :  { %215 = vmatpush.bf16.xpose.msra.mxu1 %v335_v9 }
  0x35   :  { %202 = vmatpush.bf16.xpose.msra.mxu0 %v326_v10 }
  0x36   :  { %216 = vmatpush.bf16.xpose.msra.mxu1 %v334_v11 }
  0x3d   :  { %203 = vmatpush.bf16.xpose.msra.mxu0 %v325_v12 }
  0x3e   :  { %217 = vmatpush.bf16.xpose.msra.mxu1 %v333_v13 }
  0x45   :  { %204 = vmatpush.bf16.xpose.msra.mxu0 %v324_v14 }
  0x46   :  { %218 = vmatpush.bf16.xpose.msra.mxu1 %v332_v15 }
  0x4c   :  { %205 = vmatmul.bf16.vlgmr.msra.gmra.mxu0 %v323_v16 }
  0x4d   :  { %219 = vmatmul.bf16.vlgmr.msra.gmra.mxu1 %v323_v16 }
  0xc9   :  { %v206_v17 = vpop.f32.mrf.mxu0 }
  0xca   :  { %v220_v18 = vpop.f32.mrf.mxu1  ;;  %229 = vst [vmem:[#allocation7] sm:$0xff] %v206_v17 }
  0xcb   :  { %230 = vst [vmem:[#allocation7 + $0x8] sm:$0xff] %v220_v18 }
  0xd1   :  { %v208_v19 = vpop.f32.mrf.mxu0 }
  0xd2   :  { %v222_v20 = vpop.f32.mrf.mxu1  ;;  %231 = vst [vmem:[#allocation7 + $0x10] sm:$0xff] %v208_v19 }
  0xd3   :  { %232 = vst [vmem:[#allocation7 + $0x18] sm:$0xff] %v222_v20 }
  0xd4   :  { %245 = dma.vmem_to_hbm [thread:$0]  %s238_s1, 512, %s240_s23, [#allocation4], %s431_s24, %s431_s24, %s432_s25  }
  0xd5   :  { %424 = dma.done.wait [#allocation4], 512  }
  0xd6   :  { %425 = vsyncadd [#allocation4], 4294966784 }
  0xd7   :  { %250 = vsyncpa [#allocation3], 1 }
  0xd8   :  { %251 = vsyncpa [#allocation6], 1 }
  0xd9   :  { %252 = vsyncpa [#allocation4], 1 }

</bundles_post_ra>
